<compile_context>
chip_gen: v7x
topology: tpu7x:2x2x1
jax: 0.10.0
libtpu: 0.0.40
codegen_flags: <defaults>
</compile_context>

<pallas_src>
import math

import jax
import jax.numpy as jnp
from jax.experimental import pallas as pl
from jax.experimental.pallas import tpu as pltpu

# ---- hyperparameters from temp.py -------------------------------------------
N_EMBED = 128
HIDDEN = 4 * N_EMBED          # 512
TILE_M = 128                  # rows per grid step (full MXU-height LHS tile)


# ---- Pallas kernel: one (TILE_M, C) row-slab through the MLP -----------------
def ffn_kernel(x_ref, w1_ref, b1_ref, w2_ref, b2_ref, o_ref):
    # x: (TILE_M, C) f32 -> cast to bf16 for the MXU, accumulate in f32.
    x = x_ref[...].astype(jnp.bfloat16)

    h = jnp.dot(x, w1_ref[...], preferred_element_type=jnp.float32)
    h = h + b1_ref[...]                       # (1, 4C) broadcasts over rows
    h = jnp.maximum(h, 0.0)                   # ReLU

    y = jnp.dot(h.astype(jnp.bfloat16), w2_ref[...],
                preferred_element_type=jnp.float32)
    y = y + b2_ref[...]
    # nn.Dropout(0.2) is identity in eval-mode forward.
    o_ref[...] = y


# ---- wrapper -----------------------------------------------------------------
def feedforward_forward(x, params):
    """x: (..., n_embed) float32.  Returns (..., n_embed) float32."""
    orig_shape = x.shape
    C = orig_shape[-1]
    assert C == N_EMBED

    M = int(math.prod(orig_shape[:-1]))
    x2 = x.reshape(M, C)

    # Pad rows to a multiple of TILE_M so every LHS tile is 128 rows.
    n_tiles = pl.cdiv(M, TILE_M)
    m_pad = n_tiles * TILE_M
    if m_pad != M:
        x2 = jnp.pad(x2, ((0, m_pad - M), (0, 0)))

    w1, b1, w2, b2 = params["w1"], params["b1"], params["w2"], params["b2"]

    out = pl.pallas_call(
        ffn_kernel,
        out_shape=jax.ShapeDtypeStruct((m_pad, C), jnp.float32),
        grid=(n_tiles,),
        in_specs=[
            pl.BlockSpec((TILE_M, C), lambda i: (i, 0)),     # activations
            pl.BlockSpec((C, HIDDEN), lambda i: (0, 0)),     # w1 (resident)
            pl.BlockSpec((1, HIDDEN), lambda i: (0, 0)),     # b1
            pl.BlockSpec((HIDDEN, C), lambda i: (0, 0)),     # w2 (resident)
            pl.BlockSpec((1, C), lambda i: (0, 0)),          # b2
        ],
        out_specs=pl.BlockSpec((TILE_M, C), lambda i: (i, 0)),
        compiler_params=pltpu.CompilerParams(
            dimension_semantics=("parallel",),
            vmem_limit_bytes=32 * 1024 * 1024,   # fits v5e/v6e/v7x
        ),
    )(x2, w1, b1, w2, b2)

    return out[:M].reshape(orig_shape)


# ---- deterministic parameter initialization ----------------------------------
def init_params(key):
    k1, k2 = jax.random.split(key)
    std = 0.02
    # Weights stored as (in_features, out_features) == W.T of the PyTorch layout.
    w1 = (std * jax.random.normal(k1, (N_EMBED, HIDDEN), jnp.float32)).astype(jnp.bfloat16)
    w2 = (std * jax.random.normal(k2, (HIDDEN, N_EMBED), jnp.float32)).astype(jnp.bfloat16)
    b1 = jnp.zeros((1, HIDDEN), jnp.float32) + 0.01
    b2 = jnp.zeros((1, N_EMBED), jnp.float32) - 0.01
    return dict(w1=w1, b1=b1, w2=w2, b2=b2)


# ---- pure-JAX reference (mirrors the PyTorch forward, same bf16 weights) -----
def reference_forward(x, params):
    xb = x.astype(jnp.bfloat16).astype(jnp.float32)
    w1 = params["w1"].astype(jnp.float32)
    w2 = params["w2"].astype(jnp.float32)
    h = jnp.maximum(xb @ w1 + params["b1"], 0.0)
    hb = h.astype(jnp.bfloat16).astype(jnp.float32)
    return hb @ w2 + params["b2"]


if __name__ == "__main__":
    key = jax.random.PRNGKey(0)
    pkey, xkey = jax.random.split(key)
    params = init_params(pkey)

    B, T = 2, 8
    x = jax.random.normal(xkey, (B, T, N_EMBED), dtype=jnp.float32)

    y = feedforward_forward(x, params)
    y = jax.block_until_ready(y)
    assert y.shape == (B, T, N_EMBED)

    ref = reference_forward(x, params)
    assert jnp.allclose(y, ref, atol=2e-2, rtol=2e-2), "mismatch vs reference"

    print("KERNEL_OK")
</pallas_src>

<mosaic_0001>
module attributes {stable_mosaic.version = 11 : i64} {
  func.func @ffn_kernel(%arg0: i32, %arg1: memref<128x128xf32, #tpu.memory_space<vmem>>, %arg2: memref<128x512xbf16, #tpu.memory_space<vmem>>, %arg3: memref<1x512xf32, #tpu.memory_space<vmem>>, %arg4: memref<512x128xbf16, #tpu.memory_space<vmem>>, %arg5: memref<1x128xf32, #tpu.memory_space<vmem>>, %arg6: memref<128x128xf32, #tpu.memory_space<vmem>>) attributes {dimension_semantics = [#tpu.dimension_semantics<parallel>], iteration_bounds = array<i64: 1>, scalar_prefetch = 0 : i64, scratch_operands = 0 : i64, tpu.core_type = #tpu.core_type<tc>, window_params = [{transform_indices = @transform_0, window_bounds = array<i64: 128, 128>}, {pipeline_mode = #tpu.pipeline_mode<synchronous>, transform_indices = @transform_1, window_bounds = array<i64: 128, 512>}, {pipeline_mode = #tpu.pipeline_mode<synchronous>, transform_indices = @transform_2, window_bounds = array<i64: 1, 512>}, {pipeline_mode = #tpu.pipeline_mode<synchronous>, transform_indices = @transform_3, window_bounds = array<i64: 512, 128>}, {pipeline_mode = #tpu.pipeline_mode<synchronous>, transform_indices = @transform_4, window_bounds = array<i64: 1, 128>}, {transform_indices = @transform_5, window_bounds = array<i64: 128, 128>}]} {
    %c0 = arith.constant 0 : index
    %c0_0 = arith.constant 0 : index
    %0 = vector.load %arg1[%c0, %c0_0] : memref<128x128xf32, #tpu.memory_space<vmem>>, vector<128x128xf32>
    %1 = arith.truncf %0 : vector<128x128xf32> to vector<128x128xbf16>
    %c0_1 = arith.constant 0 : index
    %c0_2 = arith.constant 0 : index
    %2 = vector.load %arg2[%c0_1, %c0_2] : memref<128x512xbf16, #tpu.memory_space<vmem>>, vector<128x512xbf16>
    %cst = arith.constant dense<0.000000e+00> : vector<128x512xf32>
    %3 = tpu.matmul %1, %2, %cst {dimension_numbers = #tpu.dot_dimension_numbers<[1], [0], [0], [1], [0, 0, 1, 1], [], []>} : vector<128x128xbf16>, vector<128x512xbf16>, vector<128x512xf32> -> vector<128x512xf32>
    %c0_3 = arith.constant 0 : index
    %c0_4 = arith.constant 0 : index
    %4 = vector.load %arg3[%c0_3, %c0_4] : memref<1x512xf32, #tpu.memory_space<vmem>>, vector<1x512xf32>
    %5 = vector.broadcast %4 : vector<1x512xf32> to vector<128x512xf32>
    %6 = arith.addf %3, %5 : vector<128x512xf32>
    %cst_5 = arith.constant 0.000000e+00 : f32
    %7 = vector.broadcast %cst_5 : f32 to vector<128x512xf32>
    %8 = arith.maximumf %6, %7 : vector<128x512xf32>
    %9 = arith.truncf %8 : vector<128x512xf32> to vector<128x512xbf16>
    %c0_6 = arith.constant 0 : index
    %c0_7 = arith.constant 0 : index
    %10 = vector.load %arg4[%c0_6, %c0_7] : memref<512x128xbf16, #tpu.memory_space<vmem>>, vector<512x128xbf16>
    %cst_8 = arith.constant dense<0.000000e+00> : vector<128x128xf32>
    %11 = tpu.matmul %9, %10, %cst_8 {dimension_numbers = #tpu.dot_dimension_numbers<[1], [0], [0], [1], [0, 0, 1, 1], [], []>} : vector<128x512xbf16>, vector<512x128xbf16>, vector<128x128xf32> -> vector<128x128xf32>
    %c0_9 = arith.constant 0 : index
    %c0_10 = arith.constant 0 : index
    %12 = vector.load %arg5[%c0_9, %c0_10] : memref<1x128xf32, #tpu.memory_space<vmem>>, vector<1x128xf32>
    %13 = vector.broadcast %12 : vector<1x128xf32> to vector<128x128xf32>
    %14 = arith.addf %11, %13 : vector<128x128xf32>
    %c0_11 = arith.constant 0 : index
    %c0_12 = arith.constant 0 : index
    %15 = vector.load %arg6[%c0_11, %c0_12] : memref<128x128xf32, #tpu.memory_space<vmem>>, vector<128x128xf32>
    tpu.vector_store %arg6[%c0_11, %c0_12], %14 {strides = array<i32>} : memref<128x128xf32, #tpu.memory_space<vmem>>, vector<128x128xf32>,
    return
  }
  func.func @transform_0(%arg0: i32) -> (i32, i32) {
    %c0_i32 = arith.constant 0 : i32
    %c0_i32_0 = arith.constant 0 : i32
    return %arg0, %c0_i32 : i32, i32
  }
  func.func @transform_1(%arg0: i32) -> (i32, i32) {
    %c0_i32 = arith.constant 0 : i32
    %c0_i32_0 = arith.constant 0 : i32
    %c0_i32_1 = arith.constant 0 : i32
    return %c0_i32, %c0_i32_0 : i32, i32
  }
  func.func @transform_2(%arg0: i32) -> (i32, i32) {
    %c0_i32 = arith.constant 0 : i32
    %c0_i32_0 = arith.constant 0 : i32
    %c0_i32_1 = arith.constant 0 : i32
    return %c0_i32, %c0_i32_0 : i32, i32
  }
  func.func @transform_3(%arg0: i32) -> (i32, i32) {
    %c0_i32 = arith.constant 0 : i32
    %c0_i32_0 = arith.constant 0 : i32
    %c0_i32_1 = arith.constant 0 : i32
    return %c0_i32, %c0_i32_0 : i32, i32
  }
  func.func @transform_4(%arg0: i32) -> (i32, i32) {
    %c0_i32 = arith.constant 0 : i32
    %c0_i32_0 = arith.constant 0 : i32
    %c0_i32_1 = arith.constant 0 : i32
    return %c0_i32, %c0_i32_0 : i32, i32
  }
  func.func @transform_5(%arg0: i32) -> (i32, i32) {
    %c0_i32 = arith.constant 0 : i32
    %c0_i32_0 = arith.constant 0 : i32
    return %arg0, %c0_i32 : i32, i32
  }
}

</mosaic_0001>

<bundles_post_ra>
// kernel: tpu_custom_call.1
= control target key start
LH: loop header
LB: loop body
LE: loop exit
PB: predicated region body
PF: predicated region fallthrough
CT: control target
= control target key end

     0   :  { %10 = vsyncpa [#allocation3], 0  ;;  %s1699_s0 = inlined_call_operand.hbm [shape: f32[128,128], index: 0, kind: input, shape index: {}]   ;;  %s1700_s1 = inlined_call_operand.hbm [shape: bf16[128,512], index: 1, kind: input, shape index: {}]   ;;  %s1701_s2 = inlined_call_operand.vmem [shape: f32[1,512], index: 2, kind: input, shape index: {}]   ;;  %s1702_s3 = inlined_call_operand.hbm [shape: bf16[512,128], index: 3, kind: input, shape index: {}]   ;;  %s1703_s4 = inlined_call_operand.vmem [shape: f32[1,128], index: 4, kind: input, shape index: {}]   ;;  %s1704_s5 = inlined_call_operand.hbm [shape: f32[128,128], index: 5, kind: output, shape index: {}]  }
   0x1   :  { %11 = vsyncpa [#allocation6], 0 }
   0x2   :  { %12 = vsyncpa [#allocation4], 0  ;;  %s1492_s18 = smov [#allocation5]   ;;  %s1398_s22 = scalar_lea.hbm %s1700_s1, 4096 }
   0x3   :  { %s30_s19 = sshll.u32 %s1492_s18, 4  ;;  %p1399_p0 = scmp.ne.s32.totalorder %s1700_s1, %s1398_s22  ;;  %s31_s19 = int_to_ptr.vmem [resolvable:$true] %s30_s19 }
   0x4   :  { %p1402_p1 = scmp.lt.u32.totalorder %s1398_s22, %s1700_s1 }
   0x6   :  { %p1404_p2 = pnand %p1402_p1, %p1399_p0 }
   0x8   :  { %1407 = shalt.err (!%p1404_p2)
}
   0x9   :  { %s1408_s27 = scalar_lea.vmem %s31_s19, 4096  ;;  %p1413_p4 = scmp.lt.s32.totalorder %s31_s19, %s31_s19 }
   0xa   :  { %p1409_p3 = scmp.ne.s32.totalorder %s31_s19, %s1408_s27  ;;  %p1414_p5 = scmp.lt.s32.totalorder %s1408_s27, %s1408_s27 }
   0xc   :  { %p1415_p6 = por %p1414_p5, %p1413_p4 }
   0xe   :  { %p1416_p7 = pnand %p1415_p6, %p1409_p3 }
  0x10   :  { %1419 = shalt.err (!%p1416_p7)
}
  0x11   :  { %s1493_s28 = smov 256   ;;  %s1494_s29 = smov 16  }
  0x12   :  { %36 = dma.hbm_to_vmem [thread:$0]  %s1700_s1, 4096, %s31_s19, [#allocation6], %s1493_s28, %s1493_s28, %s1494_s29  }
  0x13   :  { %s1495_s7 = smov [#allocation2]   ;;  %s1420_s11 = scalar_lea.hbm %s1699_s0, 2048 }
  0x14   :  { %s18_s8 = sshll.u32 %s1495_s7, 4  ;;  %p1421_p8 = scmp.ne.s32.totalorder %s1699_s0, %s1420_s11  ;;  %s19_s8 = int_to_ptr.vmem [resolvable:$true] %s18_s8 }
  0x15   :  { %p1424_p9 = scmp.lt.u32.totalorder %s1420_s11, %s1699_s0 }
  0x17   :  { %p1426_p10 = pnand %p1424_p9, %p1421_p8 }
  0x19   :  { %1429 = shalt.err (!%p1426_p10)
}
  0x1a   :  { %s1430_s16 = scalar_lea.vmem %s19_s8, 2048  ;;  %p1435_p12 = scmp.lt.s32.totalorder %s19_s8, %s19_s8 }
  0x1b   :  { %p1431_p11 = scmp.ne.s32.totalorder %s19_s8, %s1430_s16  ;;  %p1436_p13 = scmp.lt.s32.totalorder %s1430_s16, %s1430_s16 }
  0x1d   :  { %p1437_p0 = por %p1436_p13, %p1435_p12 }
  0x1f   :  { %p1438_p1 = pnand %p1437_p0, %p1431_p11 }
  0x21   :  { %1441 = shalt.err (!%p1438_p1)
}
  0x22   :  { %s1496_s1 = smov 128   ;;  %s1497_s17 = smov 8  }
  0x23   :  { %24 = dma.hbm_to_vmem [thread:$0]  %s1699_s0, 2048, %s19_s8, [#allocation3], %s1496_s1, %s1496_s1, %s1497_s17  }
  0x24   :  { %s1498_s20 = smov [#allocation7]   ;;  %s1442_s24 = scalar_lea.hbm %s1702_s3, 4096 }
  0x25   :  { %s44_s21 = sshll.u32 %s1498_s20, 4  ;;  %p1443_p2 = scmp.ne.s32.totalorder %s1702_s3, %s1442_s24  ;;  %s45_s21 = int_to_ptr.vmem [resolvable:$true] %s44_s21 }
  0x26   :  { %p1446_p3 = scmp.lt.u32.totalorder %s1442_s24, %s1702_s3 }
  0x28   :  { %p1448_p4 = pnand %p1446_p3, %p1443_p2 }
  0x2a   :  { %1451 = shalt.err (!%p1448_p4)
}
  0x2b   :  { %s1452_s29 = scalar_lea.vmem %s45_s21, 4096  ;;  %p1457_p6 = scmp.lt.s32.totalorder %s45_s21, %s45_s21 }
  0x2c   :  { %p1453_p5 = scmp.ne.s32.totalorder %s45_s21, %s1452_s29  ;;  %p1458_p7 = scmp.lt.s32.totalorder %s1452_s29, %s1452_s29 }
  0x2e   :  { %p1459_p8 = por %p1458_p7, %p1457_p6 }
  0x30   :  { %p1460_p9 = pnand %p1459_p8, %p1453_p5 }
  0x32   :  { %1463 = shalt.err (!%p1460_p9)
}
  0x33   :  { %s1499_s0 = smov 64   ;;  %s1500_s30 = smov 4  }
  0x34   :  { %50 = dma.hbm_to_vmem [thread:$0]  %s1702_s3, 4096, %s45_s21, [#allocation6], %s1499_s0, %s1499_s0, %s1500_s30  }
  0x35   :  { %1486 = dma.done.wait [#allocation3], 2048  }
  0x36   :  { %1487 = vsyncadd [#allocation3], 4294965248 }
  0x37   :  { %1488 = dma.done.wait [#allocation6], 8192  }
  0x38   :  { %1489 = vsyncadd [#allocation6], 4294959104  ;;  %v1501_v0 = vmov 0   ;;  %v1318_v1 = vld [vmem:[#allocation5 + $0x4] ss:$16 sps:$4 sm:$0xff]   ;;  %v64_v34 = vld [vmem:[#allocation2 + $0x8] sm:$0xff] }
  0x39   :  { %333 = vmatprep.mubr.bf16.mxu0 %v1501_v0  ;;  %446 = vmatprep.mubr.bf16.mxu1 %v1501_v0  ;;  %v1320_v2 = vld [vmem:[#allocation5 + $0xc] ss:$16 sps:$4 sm:$0xff]   ;;  %v1322_v3 = vld [vmem:[#allocation5] ss:$16 sps:$4 sm:$0xff]   ;;  %v1323_v4 = vld [vmem:[#allocation5 + $0x8] ss:$16 sps:$4 sm:$0xff]  }
  0x3a   :  { %301 = vmatprep.subr.bf16.mxu0 %v1318_v1  ;;  %414 = vmatprep.subr.bf16.mxu1 %v1320_v2  ;;  %v1324_v5 = vld [vmem:[#allocation5 + $0x24] ss:$16 sps:$4 sm:$0xff]   ;;  %v1326_v6 = vld [vmem:[#allocation5 + $0x2c] ss:$16 sps:$4 sm:$0xff]   ;;  %v1328_v7 = vld [vmem:[#allocation5 + $0x20] ss:$16 sps:$4 sm:$0xff]  }
  0x3b   :  { %302 = vmatpush1.bf16.msra.mxu0 %v1322_v3  ;;  %415 = vmatpush1.bf16.msra.mxu1 %v1323_v4  ;;  %v1329_v8 = vld [vmem:[#allocation5 + $0x28] ss:$16 sps:$4 sm:$0xff]   ;;  %v1330_v9 = vld [vmem:[#allocation5 + $0x44] ss:$16 sps:$4 sm:$0xff]   ;;  %v1332_v10 = vld [vmem:[#allocation5 + $0x4c] ss:$16 sps:$4 sm:$0xff]  }
  0x3c   :  { %303 = vmatprep.subr.bf16.mxu0 %v1324_v5  ;;  %416 = vmatprep.subr.bf16.mxu1 %v1326_v6  ;;  %v1334_v11 = vld [vmem:[#allocation5 + $0x40] ss:$16 sps:$4 sm:$0xff]   ;;  %v1335_v12 = vld [vmem:[#allocation5 + $0x48] ss:$16 sps:$4 sm:$0xff]   ;;  %v1336_v13 = vld [vmem:[#allocation5 + $0x64] ss:$16 sps:$4 sm:$0xff]  }
  0x3d   :  { %v1338_v14 = vld [vmem:[#allocation5 + $0x6c] ss:$16 sps:$4 sm:$0xff]   ;;  %v1340_v15 = vld [vmem:[#allocation5 + $0x60] ss:$16 sps:$4 sm:$0xff]   ;;  %v1341_v16 = vld [vmem:[#allocation5 + $0x68] ss:$16 sps:$4 sm:$0xff]  }
  0x3e   :  { %v1342_v17 = vld [vmem:[#allocation5 + $0x84] ss:$16 sps:$4 sm:$0xff]   ;;  %v1344_v18 = vld [vmem:[#allocation5 + $0x8c] ss:$16 sps:$4 sm:$0xff]   ;;  %v1346_v19 = vld [vmem:[#allocation5 + $0x80] ss:$16 sps:$4 sm:$0xff]  }
  0x3f   :  { %304 = vmatpush1.bf16.msra.mxu0 %v1328_v7  ;;  %417 = vmatpush1.bf16.msra.mxu1 %v1329_v8  ;;  %v1347_v20 = vld [vmem:[#allocation5 + $0x88] ss:$16 sps:$4 sm:$0xff]   ;;  %v1348_v21 = vld [vmem:[#allocation5 + $0xa4] ss:$16 sps:$4 sm:$0xff]   ;;  %v1350_v22 = vld [vmem:[#allocation5 + $0xac] ss:$16 sps:$4 sm:$0xff]  }
  0x40   :  { %305 = vmatprep.subr.bf16.mxu0 %v1330_v9  ;;  %418 = vmatprep.subr.bf16.mxu1 %v1332_v10  ;;  %v1352_v23 = vld [vmem:[#allocation5 + $0xa0] ss:$16 sps:$4 sm:$0xff]   ;;  %v1353_v24 = vld [vmem:[#allocation5 + $0xa8] ss:$16 sps:$4 sm:$0xff]   ;;  %v1354_v25 = vld [vmem:[#allocation5 + $0xc4] ss:$16 sps:$4 sm:$0xff]  }
  0x41   :  { %v1356_v26 = vld [vmem:[#allocation5 + $0xcc] ss:$16 sps:$4 sm:$0xff]   ;;  %v1358_v27 = vld [vmem:[#allocation5 + $0xc0] ss:$16 sps:$4 sm:$0xff]   ;;  %v1359_v28 = vld [vmem:[#allocation5 + $0xc8] ss:$16 sps:$4 sm:$0xff]  }
  0x42   :  { %v1360_v29 = vld [vmem:[#allocation5 + $0xe4] ss:$16 sps:$4 sm:$0xff]   ;;  %v1362_v30 = vld [vmem:[#allocation5 + $0xec] ss:$16 sps:$4 sm:$0xff]   ;;  %v1364_v31 = vld [vmem:[#allocation5 + $0xe0] ss:$16 sps:$4 sm:$0xff]  }
  0x43   :  { %306 = vmatpush1.bf16.msra.mxu0 %v1334_v11  ;;  %419 = vmatpush1.bf16.msra.mxu1 %v1335_v12  ;;  %v1365_v32 = vld [vmem:[#allocation5 + $0xe8] ss:$16 sps:$4 sm:$0xff]   ;;  %v63_v33 = vld [vmem:[#allocation2] sm:$0xff]  ;;  %v65_v41 = vld [vmem:[#allocation2 + $0x10] sm:$0xff] }
  0x44   :  { %307 = vmatprep.subr.bf16.mxu0 %v1336_v13  ;;  %420 = vmatprep.subr.bf16.mxu1 %v1338_v14  ;;  %v1366_v35 = vld [vmem:[#allocation7 + $0x40] sm:$0xff]   ;;  %v79_v37 = vpack.c.bf16 %v64_v34, %v63_v33  ;;  %v1370_v40 = vld [vmem:[#allocation7 + $0x48] sm:$0xff]   ;;  %v66_v42 = vld [vmem:[#allocation2 + $0x18] sm:$0xff] }
  0x45   :  { %v1368_v36 = vld [vmem:[#allocation7 + $0xc0] sm:$0xff]   ;;  %v1372_v43 = vld [vmem:[#allocation7 + $0xc8] sm:$0xff]   ;;  %v1374_v46 = vld [vmem:[#allocation7 + $0x50] sm:$0xff]   ;;  %v80_v48 = vpack.c.bf16 %v66_v42, %v65_v41 }
  0x46   :  { %v1367_v38 = vld [vmem:[#allocation7] sm:$0xff]   ;;  %v1371_v44 = vld [vmem:[#allocation7 + $0x8] sm:$0xff]   ;;  %v1376_v47 = vld [vmem:[#allocation7 + $0xd0] sm:$0xff]  }
  0x47   :  { %308 = vmatpush1.bf16.msra.mxu0 %v1340_v15  ;;  %421 = vmatpush1.bf16.msra.mxu1 %v1341_v16  ;;  %v1369_v39 = vld [vmem:[#allocation7 + $0x80] sm:$0xff]   ;;  %v1373_v45 = vld [vmem:[#allocation7 + $0x88] sm:$0xff]   ;;  %v1375_v49 = vld [vmem:[#allocation7 + $0x10] sm:$0xff]  }
  0x48   :  { %309 = vmatprep.subr.bf16.mxu0 %v1342_v17  ;;  %422 = vmatprep.subr.bf16.mxu1 %v1344_v18  ;;  %v1377_v50 = vld [vmem:[#allocation7 + $0x90] sm:$0xff]   ;;  %v1378_v51 = vld [vmem:[#allocation7 + $0x58] sm:$0xff]   ;;  %v67_v52 = vld [vmem:[#allocation2 + $0x20] sm:$0xff] }
  0x49   :  { %v68_v53 = vld [vmem:[#allocation2 + $0x28] sm:$0xff]  ;;  %v1380_v54 = vld [vmem:[#allocation7 + $0xd8] sm:$0xff]   ;;  %v1382_v57 = vld [vmem:[#allocation7 + $0x60] sm:$0xff]  }
  0x4a   :  { %v1379_v55 = vld [vmem:[#allocation7 + $0x18] sm:$0xff]   ;;  %v1384_v58 = vld [vmem:[#allocation7 + $0xe0] sm:$0xff]   ;;  %v81_v59 = vpack.c.bf16 %v68_v53, %v67_v52  ;;  %v1386_v62 = vld [vmem:[#allocation7 + $0x68] sm:$0xff]  }
  0x4b   :  { %310 = vmatpush1.bf16.msra.mxu0 %v1346_v19  ;;  %423 = vmatpush1.bf16.msra.mxu1 %v1347_v20  ;;  %v1381_v56 = vld [vmem:[#allocation7 + $0x98] sm:$0xff]   ;;  %v1383_v60 = vld [vmem:[#allocation7 + $0x20] sm:$0xff]   ;;  %v69_v63 = vld [vmem:[#allocation2 + $0x30] sm:$0xff] }
  0x4c   :  { %311 = vmatprep.subr.bf16.mxu0 %v1348_v21  ;;  %424 = vmatprep.subr.bf16.mxu1 %v1350_v22  ;;  %v1385_v61 = vld [vmem:[#allocation7 + $0xa0] sm:$0xff]   ;;  %v1388_v1 = vld [vmem:[#allocation7 + $0xe8] sm:$0xff]   ;;  %v70_v2 = vld [vmem:[#allocation2 + $0x38] sm:$0xff] }
  0x4d   :  { %v1387_v3 = vld [vmem:[#allocation7 + $0x28] sm:$0xff]   ;;  %v1390_v5 = vld [vmem:[#allocation7 + $0x70] sm:$0xff]   ;;  %v82_v7 = vpack.c.bf16 %v70_v2, %v69_v63  ;;  %v71_v10 = vld [vmem:[#allocation2 + $0x40] sm:$0xff] }
  0x4e   :  { %v1389_v4 = vld [vmem:[#allocation7 + $0xa8] sm:$0xff]   ;;  %v1392_v6 = vld [vmem:[#allocation7 + $0xf0] sm:$0xff]   ;;  %v74_v14 = vld [vmem:[#allocation2 + $0x58] sm:$0xff] }
  0x4f   :  { %312 = vmatpush1.bf16.msra.mxu0 %v1352_v23  ;;  %425 = vmatpush1.bf16.msra.mxu1 %v1353_v24  ;;  %v1391_v8 = vld [vmem:[#allocation7 + $0x30] sm:$0xff]   ;;  %v72_v11 = vld [vmem:[#allocation2 + $0x48] sm:$0xff]  ;;  %v75_v16 = vld [vmem:[#allocation2 + $0x60] sm:$0xff] }
  0x50   :  { %313 = vmatprep.subr.bf16.mxu0 %v1354_v25  ;;  %426 = vmatprep.subr.bf16.mxu1 %v1356_v26  ;;  %v1393_v9 = vld [vmem:[#allocation7 + $0xb0] sm:$0xff]   ;;  %v83_v12 = vpack.c.bf16 %v72_v11, %v71_v10  ;;  %v76_v17 = vld [vmem:[#allocation2 + $0x68] sm:$0xff]  ;;  %v78_v20 = vld [vmem:[#allocation2 + $0x78] sm:$0xff]  ;;  %v121_v26 = vlaneseq }
  0x51   :  { %v73_v13 = vld [vmem:[#allocation2 + $0x50] sm:$0xff]  ;;  %v85_v18 = vpack.c.bf16 %v76_v17, %v75_v16  ;;  %v1394_v22 = vld [vmem:[#allocation7 + $0x78] sm:$0xff]  }
  0x52   :  { %v84_v15 = vpack.c.bf16 %v74_v14, %v73_v13  ;;  %v77_v19 = vld [vmem:[#allocation2 + $0x70] sm:$0xff]  ;;  %v1396_v23 = vld [vmem:[#allocation7 + $0xf8] sm:$0xff]  }
  0x53   :  { %314 = vmatpush1.bf16.msra.mxu0 %v1358_v27  ;;  %427 = vmatpush1.bf16.msra.mxu1 %v1359_v28  ;;  %v86_v21 = vpack.c.bf16 %v78_v20, %v77_v19  ;;  %v1395_v24 = vld [vmem:[#allocation7 + $0x38] sm:$0xff]   ;;  %v122_v27 = vshrl.u32 %v121_v26, 7 }
  0x54   :  { %315 = vmatprep.subr.bf16.mxu0 %v1360_v29  ;;  %428 = vmatprep.subr.bf16.mxu1 %v1362_v30  ;;  %v1397_v25 = vld [vmem:[#allocation7 + $0xb8] sm:$0xff]  }
  0x55   :  { %v123_v28 = vsub.s32 0, %v122_v27  ;;  %v131_v29 = vsub.s32 2, %v122_v27  ;;  %v127_v30 = vsub.s32 1, %v122_v27 }
  0x57   :  { %316 = vmatpush1.bf16.msra.mxu0 %v1364_v31  ;;  %429 = vmatpush1.bf16.msra.mxu1 %v1365_v32  ;;  %v135_v31 = vsub.s32 3, %v122_v27 }
  0x58   :  { %1179 = vmatprep.subr.bf16.mxu0 %v1366_v35  ;;  %1243 = vmatprep.subr.bf16.mxu1 %v1368_v36 }
  0x5a   :  { %334 = vmatmul.mubr.bf16.vlgmr.msra.gmra.mrb[0].mxu0 %v79_v37  ;;  %447 = vmatmul.mubr.bf16.vlgmr.msra.gmra.mrb[0].mxu1 %v79_v37 }
  0x5b   :  { %343 = vmatprep.mubr.bf16.mxu0 %v1501_v0  ;;  %456 = vmatprep.mubr.bf16.mxu1 %v1501_v0 }
  0x5c   :  { %1180 = vmatpush3.bf16.msra.mxu0 %v1367_v38  ;;  %1244 = vmatpush3.bf16.msra.mxu1 %v1369_v39 }
  0x5d   :  { %1181 = vmatprep.subr.bf16.mxu0 %v1370_v40  ;;  %1245 = vmatprep.subr.bf16.mxu1 %v1372_v43 }
  0x60   :  { %1182 = vmatpush3.bf16.msra.mxu0 %v1371_v44  ;;  %1246 = vmatpush3.bf16.msra.mxu1 %v1373_v45 }
  0x61   :  { %1183 = vmatprep.subr.bf16.mxu0 %v1374_v46  ;;  %1247 = vmatprep.subr.bf16.mxu1 %v1376_v47 }
  0x62   :  { %344 = vmatmul.mubr.bf16.gmra.mrb[4].mxu0 %v80_v48  ;;  %457 = vmatmul.mubr.bf16.gmra.mrb[4].mxu1 %v80_v48 }
  0x63   :  { %353 = vmatprep.mubr.bf16.mxu0 %v1501_v0  ;;  %466 = vmatprep.mubr.bf16.mxu1 %v1501_v0 }
  0x64   :  { %1184 = vmatpush3.bf16.msra.mxu0 %v1375_v49  ;;  %1248 = vmatpush3.bf16.msra.mxu1 %v1377_v50 }
  0x65   :  { %1185 = vmatprep.subr.bf16.mxu0 %v1378_v51  ;;  %1249 = vmatprep.subr.bf16.mxu1 %v1380_v54 }
  0x68   :  { %1186 = vmatpush3.bf16.msra.mxu0 %v1379_v55  ;;  %1250 = vmatpush3.bf16.msra.mxu1 %v1381_v56 }
  0x69   :  { %1187 = vmatprep.subr.bf16.mxu0 %v1382_v57  ;;  %1251 = vmatprep.subr.bf16.mxu1 %v1384_v58 }
  0x6a   :  { %354 = vmatmul.mubr.bf16.gmra.mrb[8].mxu0 %v81_v59  ;;  %467 = vmatmul.mubr.bf16.gmra.mrb[8].mxu1 %v81_v59 }
  0x6b   :  { %363 = vmatprep.mubr.bf16.mxu0 %v1501_v0  ;;  %476 = vmatprep.mubr.bf16.mxu1 %v1501_v0 }
  0x6c   :  { %1188 = vmatpush3.bf16.msra.mxu0 %v1383_v60  ;;  %1252 = vmatpush3.bf16.msra.mxu1 %v1385_v61 }
  0x6d   :  { %1189 = vmatprep.subr.bf16.mxu0 %v1386_v62  ;;  %1253 = vmatprep.subr.bf16.mxu1 %v1388_v1 }
  0x70   :  { %1190 = vmatpush3.bf16.msra.mxu0 %v1387_v3  ;;  %1254 = vmatpush3.bf16.msra.mxu1 %v1389_v4 }
  0x71   :  { %1191 = vmatprep.subr.bf16.mxu0 %v1390_v5  ;;  %1255 = vmatprep.subr.bf16.mxu1 %v1392_v6 }
  0x72   :  { %364 = vmatmul.mubr.bf16.gmra.mrb[12].mxu0 %v82_v7  ;;  %477 = vmatmul.mubr.bf16.gmra.mrb[12].mxu1 %v82_v7 }
  0x73   :  { %373 = vmatprep.mubr.bf16.mxu0 %v1501_v0  ;;  %486 = vmatprep.mubr.bf16.mxu1 %v1501_v0 }
  0x74   :  { %1192 = vmatpush3.bf16.msra.mxu0 %v1391_v8  ;;  %1256 = vmatpush3.bf16.msra.mxu1 %v1393_v9 }
  0x75   :  { %1193 = vmatprep.subr.bf16.mxu0 %v1394_v22  ;;  %1257 = vmatprep.subr.bf16.mxu1 %v1396_v23 }
  0x78   :  { %1194 = vmatpush3.bf16.msra.mxu0 %v1395_v24  ;;  %1258 = vmatpush3.bf16.msra.mxu1 %v1397_v25 }
  0x7a   :  { %374 = vmatmul.mubr.bf16.gmra.mrb[16].mxu0 %v83_v12  ;;  %487 = vmatmul.mubr.bf16.gmra.mrb[16].mxu1 %v83_v12 }
  0x7b   :  { %383 = vmatprep.mubr.bf16.mxu0 %v1501_v0  ;;  %496 = vmatprep.mubr.bf16.mxu1 %v1501_v0 }
  0x82   :  { %384 = vmatmul.mubr.bf16.gmra.mrb[20].mxu0 %v84_v15  ;;  %497 = vmatmul.mubr.bf16.gmra.mrb[20].mxu1 %v84_v15 }
  0x83   :  { %393 = vmatprep.mubr.bf16.mxu0 %v1501_v0  ;;  %506 = vmatprep.mubr.bf16.mxu1 %v1501_v0 }
  0x8a   :  { %394 = vmatmul.mubr.bf16.gmra.mrb[24].mxu0 %v85_v18  ;;  %507 = vmatmul.mubr.bf16.gmra.mrb[24].mxu1 %v85_v18 }
  0x8b   :  { %403 = vmatprep.mubr.bf16.mxu0 %v1501_v0  ;;  %516 = vmatprep.mubr.bf16.mxu1 %v1501_v0  ;;  %v119_v0 = vld [vmem:[%s1701_s2] sm:$0xf] }
  0x8c   :  { %v1591_v32 = vrot.slane %v119_v0, %v123_v28  ;;  %v1593_v33 = vrot.slane %v119_v0, %v131_v29  ;;  %v1595_v34 = vrot.slane %v119_v0, %v127_v30  ;;  %v1597_v35 = vrot.slane %v119_v0, %v135_v31 }
  0x92   :  { %404 = vmatmul.mubr.bf16.gmra.mrb[28].mxu0 %v86_v21  ;;  %517 = vmatmul.mubr.bf16.gmra.mrb[28].mxu1 %v86_v21 }
 0x12d   :  { %v335_v36 = vpop.f32.mrb[0].mxu0  ;;  %v448_v37 = vpop.f32.mrb[0].mxu1 }
 0x12e   :  { %v336_v38 = vadd.f32 %v335_v36, %v1591_v32  ;;  %v449_v39 = vadd.f32 %v448_v37, %v1593_v33  ;;  %v337_v40 = vpop.f32.mrb[1].mxu0  ;;  %v450_v41 = vpop.f32.mrb[1].mxu1 }
 0x12f   :  { %v338_v42 = vadd.f32 %v337_v40, %v1595_v34  ;;  %v451_v43 = vadd.f32 %v450_v41, %v1597_v35  ;;  %v339_v44 = vpop.f32.mrb[2].mxu0  ;;  %v452_v45 = vpop.f32.mrb[2].mxu1 }
 0x130   :  { %v529_v46 = vmax.f32 %v449_v39, 0.0  ;;  %v340_v47 = vadd.f32 %v339_v44, %v1591_v32  ;;  %v453_v48 = vadd.f32 %v452_v45, %v1593_v33  ;;  %v341_v49 = vpop.f32.mrb[3].mxu0  ;;  %v454_v50 = vpop.f32.mrb[3].mxu1  ;;  %v527_v54 = vmax.f32 %v336_v38, 0.0 }
 0x131   :  { %v530_v51 = vmax.f32 %v451_v43, 0.0  ;;  %v342_v52 = vadd.f32 %v341_v49, %v1595_v34  ;;  %v455_v53 = vadd.f32 %v454_v50, %v1597_v35  ;;  %v528_v57 = vmax.f32 %v338_v42, 0.0 }
 0x132   :  { %v531_v55 = vmax.f32 %v340_v47, 0.0  ;;  %v533_v56 = vmax.f32 %v453_v48, 0.0 }
 0x133   :  { %v532_v58 = vmax.f32 %v342_v52, 0.0  ;;  %v534_v59 = vmax.f32 %v455_v53, 0.0 }
 0x134   :  { %v591_v60 = vpack.c.bf16 %v531_v55, %v527_v54  ;;  %v593_v61 = vpack.c.bf16 %v533_v56, %v529_v46 }
 0x135   :  { %v592_v62 = vpack.c.bf16 %v532_v58, %v528_v57  ;;  %v594_v63 = vpack.c.bf16 %v534_v59, %v530_v51  ;;  %v345_v1 = vpop.f32.mrb[4].mxu0  ;;  %v458_v2 = vpop.f32.mrb[4].mxu1 }
 0x136   :  { %v346_v3 = vadd.f32 %v345_v1, %v1591_v32  ;;  %v459_v4 = vadd.f32 %v458_v2, %v1593_v33  ;;  %v347_v5 = vpop.f32.mrb[5].mxu0  ;;  %v460_v6 = vpop.f32.mrb[5].mxu1 }
 0x137   :  { %v348_v7 = vadd.f32 %v347_v5, %v1595_v34  ;;  %v461_v8 = vadd.f32 %v460_v6, %v1597_v35  ;;  %v349_v9 = vpop.f32.mrb[6].mxu0  ;;  %v462_v10 = vpop.f32.mrb[6].mxu1  ;;  %918 = vmatprep.mubr.bf16.mxu0 %v592_v62  ;;  %1015 = vmatprep.mubr.bf16.mxu1 %v594_v63 }
 0x138   :  { %v537_v11 = vmax.f32 %v459_v4, 0.0  ;;  %v350_v12 = vadd.f32 %v349_v9, %v1591_v32  ;;  %v463_v13 = vadd.f32 %v462_v10, %v1593_v33  ;;  %v351_v14 = vpop.f32.mrb[7].mxu0  ;;  %v464_v15 = vpop.f32.mrb[7].mxu1  ;;  %919 = vmatmul.mubr.bf16.vlgmr.msra.gmra.mrb[32].mxu0 %v591_v60  ;;  %1016 = vmatmul.mubr.bf16.vlgmr.msra.gmra.mrb[32].mxu1 %v593_v61  ;;  %v535_v19 = vmax.f32 %v346_v3, 0.0 }
 0x139   :  { %v538_v16 = vmax.f32 %v461_v8, 0.0  ;;  %v352_v17 = vadd.f32 %v351_v14, %v1595_v34  ;;  %v465_v18 = vadd.f32 %v464_v15, %v1597_v35  ;;  %v536_v22 = vmax.f32 %v348_v7, 0.0 }
 0x13a   :  { %v539_v20 = vmax.f32 %v350_v12, 0.0  ;;  %v541_v21 = vmax.f32 %v463_v13, 0.0 }
 0x13b   :  { %v540_v23 = vmax.f32 %v352_v17, 0.0  ;;  %v542_v24 = vmax.f32 %v465_v18, 0.0 }
 0x13c   :  { %v595_v25 = vpack.c.bf16 %v539_v20, %v535_v19  ;;  %v597_v26 = vpack.c.bf16 %v541_v21, %v537_v11 }
 0x13d   :  { %v596_v27 = vpack.c.bf16 %v540_v23, %v536_v22  ;;  %v598_v28 = vpack.c.bf16 %v542_v24, %v538_v16  ;;  %v355_v29 = vpop.f32.mrb[8].mxu0  ;;  %v468_v0 = vpop.f32.mrb[8].mxu1 }
 0x13e   :  { %v356_v30 = vadd.f32 %v355_v29, %v1591_v32  ;;  %v469_v31 = vadd.f32 %v468_v0, %v1593_v33  ;;  %v357_v36 = vpop.f32.mrb[9].mxu0  ;;  %v470_v37 = vpop.f32.mrb[9].mxu1 }
 0x13f   :  { %v358_v38 = vadd.f32 %v357_v36, %v1595_v34  ;;  %v471_v39 = vadd.f32 %v470_v37, %v1597_v35  ;;  %v359_v40 = vpop.f32.mrb[10].mxu0  ;;  %v472_v41 = vpop.f32.mrb[10].mxu1  ;;  %926 = vmatprep.mubr.bf16.mxu0 %v596_v27  ;;  %1023 = vmatprep.mubr.bf16.mxu1 %v598_v28 }
 0x140   :  { %v545_v42 = vmax.f32 %v469_v31, 0.0  ;;  %v360_v43 = vadd.f32 %v359_v40, %v1591_v32  ;;  %v473_v44 = vadd.f32 %v472_v41, %v1593_v33  ;;  %v361_v45 = vpop.f32.mrb[11].mxu0  ;;  %v474_v46 = vpop.f32.mrb[11].mxu1  ;;  %927 = vmatmul.mubr.bf16.gmra.mrb[36].mxu0 %v595_v25  ;;  %1024 = vmatmul.mubr.bf16.gmra.mrb[36].mxu1 %v597_v26  ;;  %v543_v50 = vmax.f32 %v356_v30, 0.0 }
 0x141   :  { %v546_v47 = vmax.f32 %v471_v39, 0.0  ;;  %v362_v48 = vadd.f32 %v361_v45, %v1595_v34  ;;  %v475_v49 = vadd.f32 %v474_v46, %v1597_v35  ;;  %v544_v53 = vmax.f32 %v358_v38, 0.0 }
 0x142   :  { %v547_v51 = vmax.f32 %v360_v43, 0.0  ;;  %v549_v52 = vmax.f32 %v473_v44, 0.0 }
 0x143   :  { %v548_v54 = vmax.f32 %v362_v48, 0.0  ;;  %v550_v55 = vmax.f32 %v475_v49, 0.0 }
 0x144   :  { %v599_v56 = vpack.c.bf16 %v547_v51, %v543_v50  ;;  %v601_v57 = vpack.c.bf16 %v549_v52, %v545_v42 }
 0x145   :  { %v600_v58 = vpack.c.bf16 %v548_v54, %v544_v53  ;;  %v602_v59 = vpack.c.bf16 %v550_v55, %v546_v47  ;;  %v365_v60 = vpop.f32.mrb[12].mxu0  ;;  %v478_v61 = vpop.f32.mrb[12].mxu1 }
 0x146   :  { %v366_v62 = vadd.f32 %v365_v60, %v1591_v32  ;;  %v479_v63 = vadd.f32 %v478_v61, %v1593_v33  ;;  %v367_v1 = vpop.f32.mrb[13].mxu0  ;;  %v480_v2 = vpop.f32.mrb[13].mxu1 }
 0x147   :  { %v368_v3 = vadd.f32 %v367_v1, %v1595_v34  ;;  %v481_v4 = vadd.f32 %v480_v2, %v1597_v35  ;;  %v369_v5 = vpop.f32.mrb[14].mxu0  ;;  %v482_v6 = vpop.f32.mrb[14].mxu1  ;;  %934 = vmatprep.mubr.bf16.mxu0 %v600_v58  ;;  %1031 = vmatprep.mubr.bf16.mxu1 %v602_v59 }
 0x148   :  { %v553_v7 = vmax.f32 %v479_v63, 0.0  ;;  %v370_v8 = vadd.f32 %v369_v5, %v1591_v32  ;;  %v483_v9 = vadd.f32 %v482_v6, %v1593_v33  ;;  %v371_v10 = vpop.f32.mrb[15].mxu0  ;;  %v484_v11 = vpop.f32.mrb[15].mxu1  ;;  %935 = vmatmul.mubr.bf16.gmra.mrb[40].mxu0 %v599_v56  ;;  %1032 = vmatmul.mubr.bf16.gmra.mrb[40].mxu1 %v601_v57  ;;  %v551_v15 = vmax.f32 %v366_v62, 0.0 }
 0x149   :  { %v554_v12 = vmax.f32 %v481_v4, 0.0  ;;  %v372_v13 = vadd.f32 %v371_v10, %v1595_v34  ;;  %v485_v14 = vadd.f32 %v484_v11, %v1597_v35  ;;  %v552_v18 = vmax.f32 %v368_v3, 0.0 }
 0x14a   :  { %v555_v16 = vmax.f32 %v370_v8, 0.0  ;;  %v557_v17 = vmax.f32 %v483_v9, 0.0 }
 0x14b   :  { %v556_v19 = vmax.f32 %v372_v13, 0.0  ;;  %v558_v20 = vmax.f32 %v485_v14, 0.0 }
 0x14c   :  { %v603_v21 = vpack.c.bf16 %v555_v16, %v551_v15  ;;  %v605_v22 = vpack.c.bf16 %v557_v17, %v553_v7 }
 0x14d   :  { %v604_v23 = vpack.c.bf16 %v556_v19, %v552_v18  ;;  %v606_v24 = vpack.c.bf16 %v558_v20, %v554_v12  ;;  %v375_v25 = vpop.f32.mrb[16].mxu0  ;;  %v488_v26 = vpop.f32.mrb[16].mxu1 }
 0x14e   :  { %v376_v27 = vadd.f32 %v375_v25, %v1591_v32  ;;  %v489_v28 = vadd.f32 %v488_v26, %v1593_v33  ;;  %v377_v29 = vpop.f32.mrb[17].mxu0  ;;  %v490_v0 = vpop.f32.mrb[17].mxu1 }
 0x14f   :  { %v378_v30 = vadd.f32 %v377_v29, %v1595_v34  ;;  %v491_v31 = vadd.f32 %v490_v0, %v1597_v35  ;;  %v379_v36 = vpop.f32.mrb[18].mxu0  ;;  %v492_v37 = vpop.f32.mrb[18].mxu1  ;;  %942 = vmatprep.mubr.bf16.mxu0 %v604_v23  ;;  %1039 = vmatprep.mubr.bf16.mxu1 %v606_v24 }
 0x150   :  { %v561_v38 = vmax.f32 %v489_v28, 0.0  ;;  %v380_v39 = vadd.f32 %v379_v36, %v1591_v32  ;;  %v493_v40 = vadd.f32 %v492_v37, %v1593_v33  ;;  %v381_v41 = vpop.f32.mrb[19].mxu0  ;;  %v494_v42 = vpop.f32.mrb[19].mxu1  ;;  %943 = vmatmul.mubr.bf16.gmra.mrb[44].mxu0 %v603_v21  ;;  %1040 = vmatmul.mubr.bf16.gmra.mrb[44].mxu1 %v605_v22  ;;  %v559_v46 = vmax.f32 %v376_v27, 0.0 }
 0x151   :  { %v562_v43 = vmax.f32 %v491_v31, 0.0  ;;  %v382_v44 = vadd.f32 %v381_v41, %v1595_v34  ;;  %v495_v45 = vadd.f32 %v494_v42, %v1597_v35  ;;  %v560_v49 = vmax.f32 %v378_v30, 0.0 }
 0x152   :  { %v563_v47 = vmax.f32 %v380_v39, 0.0  ;;  %v565_v48 = vmax.f32 %v493_v40, 0.0 }
 0x153   :  { %v564_v50 = vmax.f32 %v382_v44, 0.0  ;;  %v566_v51 = vmax.f32 %v495_v45, 0.0 }
 0x154   :  { %v607_v52 = vpack.c.bf16 %v563_v47, %v559_v46  ;;  %v609_v53 = vpack.c.bf16 %v565_v48, %v561_v38 }
 0x155   :  { %v608_v54 = vpack.c.bf16 %v564_v50, %v560_v49  ;;  %v610_v55 = vpack.c.bf16 %v566_v51, %v562_v43  ;;  %v385_v56 = vpop.f32.mrb[20].mxu0  ;;  %v498_v57 = vpop.f32.mrb[20].mxu1 }
 0x156   :  { %v386_v58 = vadd.f32 %v385_v56, %v1591_v32  ;;  %v499_v59 = vadd.f32 %v498_v57, %v1593_v33  ;;  %v387_v60 = vpop.f32.mrb[21].mxu0  ;;  %v500_v61 = vpop.f32.mrb[21].mxu1 }
 0x157   :  { %v388_v62 = vadd.f32 %v387_v60, %v1595_v34  ;;  %v501_v63 = vadd.f32 %v500_v61, %v1597_v35  ;;  %v389_v1 = vpop.f32.mrb[22].mxu0  ;;  %v502_v2 = vpop.f32.mrb[22].mxu1  ;;  %950 = vmatprep.mubr.bf16.mxu0 %v608_v54  ;;  %1047 = vmatprep.mubr.bf16.mxu1 %v610_v55 }
 0x158   :  { %v569_v3 = vmax.f32 %v499_v59, 0.0  ;;  %v390_v4 = vadd.f32 %v389_v1, %v1591_v32  ;;  %v503_v5 = vadd.f32 %v502_v2, %v1593_v33  ;;  %v391_v6 = vpop.f32.mrb[23].mxu0  ;;  %v504_v7 = vpop.f32.mrb[23].mxu1  ;;  %951 = vmatmul.mubr.bf16.gmra.mrb[48].mxu0 %v607_v52  ;;  %1048 = vmatmul.mubr.bf16.gmra.mrb[48].mxu1 %v609_v53  ;;  %v567_v11 = vmax.f32 %v386_v58, 0.0 }
 0x159   :  { %v570_v8 = vmax.f32 %v501_v63, 0.0  ;;  %v392_v9 = vadd.f32 %v391_v6, %v1595_v34  ;;  %v505_v10 = vadd.f32 %v504_v7, %v1597_v35  ;;  %v568_v14 = vmax.f32 %v388_v62, 0.0 }
 0x15a   :  { %v571_v12 = vmax.f32 %v390_v4, 0.0  ;;  %v573_v13 = vmax.f32 %v503_v5, 0.0 }
 0x15b   :  { %v572_v15 = vmax.f32 %v392_v9, 0.0  ;;  %v574_v16 = vmax.f32 %v505_v10, 0.0 }
 0x15c   :  { %v611_v17 = vpack.c.bf16 %v571_v12, %v567_v11  ;;  %v613_v18 = vpack.c.bf16 %v573_v13, %v569_v3 }
 0x15d   :  { %v612_v19 = vpack.c.bf16 %v572_v15, %v568_v14  ;;  %v614_v20 = vpack.c.bf16 %v574_v16, %v570_v8  ;;  %v395_v21 = vpop.f32.mrb[24].mxu0  ;;  %v508_v22 = vpop.f32.mrb[24].mxu1 }
 0x15e   :  { %v396_v23 = vadd.f32 %v395_v21, %v1591_v32  ;;  %v509_v24 = vadd.f32 %v508_v22, %v1593_v33  ;;  %v397_v25 = vpop.f32.mrb[25].mxu0  ;;  %v510_v26 = vpop.f32.mrb[25].mxu1 }
 0x15f   :  { %v398_v27 = vadd.f32 %v397_v25, %v1595_v34  ;;  %v511_v28 = vadd.f32 %v510_v26, %v1597_v35  ;;  %v399_v29 = vpop.f32.mrb[26].mxu0  ;;  %v512_v0 = vpop.f32.mrb[26].mxu1  ;;  %958 = vmatprep.mubr.bf16.mxu0 %v612_v19  ;;  %1055 = vmatprep.mubr.bf16.mxu1 %v614_v20 }
 0x160   :  { %v577_v30 = vmax.f32 %v509_v24, 0.0  ;;  %v400_v31 = vadd.f32 %v399_v29, %v1591_v32  ;;  %v513_v36 = vadd.f32 %v512_v0, %v1593_v33  ;;  %v401_v37 = vpop.f32.mrb[27].mxu0  ;;  %v514_v38 = vpop.f32.mrb[27].mxu1  ;;  %959 = vmatmul.mubr.bf16.gmra.mrb[52].mxu0 %v611_v17  ;;  %1056 = vmatmul.mubr.bf16.gmra.mrb[52].mxu1 %v613_v18  ;;  %v575_v42 = vmax.f32 %v396_v23, 0.0 }
 0x161   :  { %v578_v39 = vmax.f32 %v511_v28, 0.0  ;;  %v402_v40 = vadd.f32 %v401_v37, %v1595_v34  ;;  %v515_v41 = vadd.f32 %v514_v38, %v1597_v35  ;;  %v576_v45 = vmax.f32 %v398_v27, 0.0 }
 0x162   :  { %v579_v43 = vmax.f32 %v400_v31, 0.0  ;;  %v581_v44 = vmax.f32 %v513_v36, 0.0 }
 0x163   :  { %v580_v46 = vmax.f32 %v402_v40, 0.0  ;;  %v582_v47 = vmax.f32 %v515_v41, 0.0 }
 0x164   :  { %v615_v48 = vpack.c.bf16 %v579_v43, %v575_v42  ;;  %v617_v49 = vpack.c.bf16 %v581_v44, %v577_v30 }
 0x165   :  { %v616_v50 = vpack.c.bf16 %v580_v46, %v576_v45  ;;  %v618_v51 = vpack.c.bf16 %v582_v47, %v578_v39  ;;  %v405_v52 = vpop.f32.mrb[28].mxu0  ;;  %v518_v53 = vpop.f32.mrb[28].mxu1 }
 0x166   :  { %v406_v54 = vadd.f32 %v405_v52, %v1591_v32  ;;  %v519_v55 = vadd.f32 %v518_v53, %v1593_v33  ;;  %v407_v56 = vpop.f32.mrb[29].mxu0  ;;  %v520_v57 = vpop.f32.mrb[29].mxu1 }
 0x167   :  { %v408_v58 = vadd.f32 %v407_v56, %v1595_v34  ;;  %v521_v59 = vadd.f32 %v520_v57, %v1597_v35  ;;  %v409_v60 = vpop.f32.mrb[30].mxu0  ;;  %v522_v61 = vpop.f32.mrb[30].mxu1  ;;  %966 = vmatprep.mubr.bf16.mxu0 %v616_v50  ;;  %1063 = vmatprep.mubr.bf16.mxu1 %v618_v51 }
 0x168   :  { %v585_v62 = vmax.f32 %v519_v55, 0.0  ;;  %v410_v63 = vadd.f32 %v409_v60, %v1591_v32  ;;  %v523_v1 = vadd.f32 %v522_v61, %v1593_v33  ;;  %v411_v2 = vpop.f32.mrb[31].mxu0  ;;  %v524_v3 = vpop.f32.mrb[31].mxu1  ;;  %967 = vmatmul.mubr.bf16.gmra.mrb[56].mxu0 %v615_v48  ;;  %1064 = vmatmul.mubr.bf16.gmra.mrb[56].mxu1 %v617_v49  ;;  %v583_v7 = vmax.f32 %v406_v54, 0.0 }
 0x169   :  { %v586_v4 = vmax.f32 %v521_v59, 0.0  ;;  %v412_v5 = vadd.f32 %v411_v2, %v1595_v34  ;;  %v525_v6 = vadd.f32 %v524_v3, %v1597_v35  ;;  %v584_v10 = vmax.f32 %v408_v58, 0.0  ;;  %v1666_v34 = vld [vmem:[%s1703_s4] ss:$0 sm:$0xff]  ;;  %s1502_s4 = smov [#allocation8]  }
 0x16a   :  { %v587_v8 = vmax.f32 %v410_v63, 0.0  ;;  %v589_v9 = vmax.f32 %v523_v1, 0.0  ;;  %s1101_s10 = sshll.u32 %s1502_s4, 4  ;;  %s1102_s10 = int_to_ptr.vmem [resolvable:$true] %s1101_s10 }
 0x16b   :  { %v588_v11 = vmax.f32 %v412_v5, 0.0  ;;  %v590_v12 = vmax.f32 %v525_v6, 0.0  ;;  %s1464_s11 = scalar_lea.vmem %s1102_s10, 2048  ;;  %p1469_p11 = scmp.lt.s32.totalorder %s1102_s10, %s1102_s10 }
 0x16c   :  { %v619_v13 = vpack.c.bf16 %v587_v8, %v583_v7  ;;  %v621_v14 = vpack.c.bf16 %v589_v9, %v585_v62  ;;  %p1465_p10 = scmp.ne.s32.totalorder %s1102_s10, %s1464_s11  ;;  %p1470_p12 = scmp.lt.s32.totalorder %s1464_s11, %s1464_s11 }
 0x16d   :  { %v620_v32 = vpack.c.bf16 %v588_v11, %v584_v10  ;;  %v622_v15 = vpack.c.bf16 %v590_v12, %v586_v4 }
 0x16e   :  { %p1471_p13 = por %p1470_p12, %p1469_p11 }
 0x16f   :  { %974 = vmatprep.mubr.bf16.mxu0 %v620_v32  ;;  %1071 = vmatprep.mubr.bf16.mxu1 %v622_v15 }
 0x170   :  { %975 = vmatmul.mubr.bf16.gmra.mrb[60].mxu0 %v619_v13  ;;  %1072 = vmatmul.mubr.bf16.gmra.mrb[60].mxu1 %v621_v14  ;;  %p1472_p0 = pnand %p1471_p13, %p1465_p10 }
 0x20b   :  { %v1195_v33 = vpop.f32.mrb[32].mxu0  ;;  %v1259_v16 = vpop.f32.mrb[32].mxu1 }
 0x20c   :  { %v1196_v35 = vpop.f32.mrb[33].mxu0  ;;  %v1260_v17 = vpop.f32.mrb[33].mxu1 }
 0x20d   :  { %v1197_v18 = vadd.f32 %v1196_v35, %v1195_v33  ;;  %v1261_v19 = vadd.f32 %v1260_v17, %v1259_v16  ;;  %v1198_v20 = vpop.f32.mrb[34].mxu0  ;;  %v1262_v21 = vpop.f32.mrb[34].mxu1 }
 0x20e   :  { %v1199_v22 = vpop.f32.mrb[35].mxu0  ;;  %v1263_v23 = vpop.f32.mrb[35].mxu1 }
 0x20f   :  { %v921_v24 = vadd.f32 %v1197_v18, %v1666_v34  ;;  %v1200_v25 = vadd.f32 %v1199_v22, %v1198_v20  ;;  %v1264_v26 = vadd.f32 %v1263_v23, %v1262_v21 }
 0x211   :  { %v1018_v27 = vadd.f32 %v1261_v19, %v921_v24  ;;  %v924_v28 = vadd.f32 %v1200_v25, %v1666_v34 }
 0x213   :  { %1080 = vst [vmem:[#allocation8] sm:$0xff] %v1018_v27  ;;  %v1021_v29 = vadd.f32 %v1264_v26, %v924_v28  ;;  %v1201_v0 = vpop.f32.mrb[36].mxu0  ;;  %v1265_v30 = vpop.f32.mrb[36].mxu1 }
 0x214   :  { %v1202_v31 = vpop.f32.mrb[37].mxu0  ;;  %v1266_v36 = vpop.f32.mrb[37].mxu1 }
 0x215   :  { %1081 = vst [vmem:[#allocation8 + $0x8] sm:$0xff] %v1021_v29  ;;  %v1203_v37 = vadd.f32 %v1202_v31, %v1201_v0  ;;  %v1267_v38 = vadd.f32 %v1266_v36, %v1265_v30  ;;  %v1204_v39 = vpop.f32.mrb[38].mxu0  ;;  %v1268_v40 = vpop.f32.mrb[38].mxu1 }
 0x216   :  { %v1205_v41 = vpop.f32.mrb[39].mxu0  ;;  %v1269_v42 = vpop.f32.mrb[39].mxu1 }
 0x217   :  { %v929_v43 = vadd.f32 %v1203_v37, %v1666_v34  ;;  %v1206_v44 = vadd.f32 %v1205_v41, %v1204_v39  ;;  %v1270_v45 = vadd.f32 %v1269_v42, %v1268_v40 }
 0x219   :  { %v1026_v46 = vadd.f32 %v1267_v38, %v929_v43  ;;  %v932_v47 = vadd.f32 %v1206_v44, %v1666_v34 }
 0x21b   :  { %1082 = vst [vmem:[#allocation8 + $0x10] sm:$0xff] %v1026_v46  ;;  %v1029_v48 = vadd.f32 %v1270_v45, %v932_v47  ;;  %v1207_v49 = vpop.f32.mrb[40].mxu0  ;;  %v1271_v50 = vpop.f32.mrb[40].mxu1 }
 0x21c   :  { %v1208_v51 = vpop.f32.mrb[41].mxu0  ;;  %v1272_v52 = vpop.f32.mrb[41].mxu1 }
 0x21d   :  { %1083 = vst [vmem:[#allocation8 + $0x18] sm:$0xff] %v1029_v48  ;;  %v1209_v53 = vadd.f32 %v1208_v51, %v1207_v49  ;;  %v1273_v54 = vadd.f32 %v1272_v52, %v1271_v50  ;;  %v1210_v55 = vpop.f32.mrb[42].mxu0  ;;  %v1274_v56 = vpop.f32.mrb[42].mxu1 }
 0x21e   :  { %v1211_v57 = vpop.f32.mrb[43].mxu0  ;;  %v1275_v58 = vpop.f32.mrb[43].mxu1 }
 0x21f   :  { %v937_v59 = vadd.f32 %v1209_v53, %v1666_v34  ;;  %v1212_v60 = vadd.f32 %v1211_v57, %v1210_v55  ;;  %v1276_v61 = vadd.f32 %v1275_v58, %v1274_v56 }
 0x221   :  { %v1034_v62 = vadd.f32 %v1273_v54, %v937_v59  ;;  %v940_v63 = vadd.f32 %v1212_v60, %v1666_v34 }
 0x223   :  { %1084 = vst [vmem:[#allocation8 + $0x20] sm:$0xff] %v1034_v62  ;;  %v1037_v1 = vadd.f32 %v1276_v61, %v940_v63  ;;  %v1213_v2 = vpop.f32.mrb[44].mxu0  ;;  %v1277_v3 = vpop.f32.mrb[44].mxu1 }
 0x224   :  { %v1214_v4 = vpop.f32.mrb[45].mxu0  ;;  %v1278_v5 = vpop.f32.mrb[45].mxu1 }
 0x225   :  { %1085 = vst [vmem:[#allocation8 + $0x28] sm:$0xff] %v1037_v1  ;;  %v1215_v6 = vadd.f32 %v1214_v4, %v1213_v2  ;;  %v1279_v7 = vadd.f32 %v1278_v5, %v1277_v3  ;;  %v1216_v8 = vpop.f32.mrb[46].mxu0  ;;  %v1280_v9 = vpop.f32.mrb[46].mxu1 }
 0x226   :  { %v1217_v10 = vpop.f32.mrb[47].mxu0  ;;  %v1281_v11 = vpop.f32.mrb[47].mxu1 }
 0x227   :  { %v945_v12 = vadd.f32 %v1215_v6, %v1666_v34  ;;  %v1218_v13 = vadd.f32 %v1217_v10, %v1216_v8  ;;  %v1282_v14 = vadd.f32 %v1281_v11, %v1280_v9 }
 0x229   :  { %v1042_v32 = vadd.f32 %v1279_v7, %v945_v12  ;;  %v948_v15 = vadd.f32 %v1218_v13, %v1666_v34 }
 0x22b   :  { %1086 = vst [vmem:[#allocation8 + $0x30] sm:$0xff] %v1042_v32  ;;  %v1045_v33 = vadd.f32 %v1282_v14, %v948_v15  ;;  %v1219_v16 = vpop.f32.mrb[48].mxu0  ;;  %v1283_v35 = vpop.f32.mrb[48].mxu1 }
 0x22c   :  { %v1220_v17 = vpop.f32.mrb[49].mxu0  ;;  %v1284_v18 = vpop.f32.mrb[49].mxu1 }
 0x22d   :  { %1087 = vst [vmem:[#allocation8 + $0x38] sm:$0xff] %v1045_v33  ;;  %v1221_v19 = vadd.f32 %v1220_v17, %v1219_v16  ;;  %v1285_v20 = vadd.f32 %v1284_v18, %v1283_v35  ;;  %v1222_v21 = vpop.f32.mrb[50].mxu0  ;;  %v1286_v22 = vpop.f32.mrb[50].mxu1 }
 0x22e   :  { %v1223_v23 = vpop.f32.mrb[51].mxu0  ;;  %v1287_v24 = vpop.f32.mrb[51].mxu1 }
 0x22f   :  { %v953_v25 = vadd.f32 %v1221_v19, %v1666_v34  ;;  %v1224_v26 = vadd.f32 %v1223_v23, %v1222_v21  ;;  %v1288_v27 = vadd.f32 %v1287_v24, %v1286_v22 }
 0x231   :  { %v1050_v28 = vadd.f32 %v1285_v20, %v953_v25  ;;  %v956_v29 = vadd.f32 %v1224_v26, %v1666_v34 }
 0x233   :  { %1088 = vst [vmem:[#allocation8 + $0x40] sm:$0xff] %v1050_v28  ;;  %v1053_v0 = vadd.f32 %v1288_v27, %v956_v29  ;;  %v1225_v30 = vpop.f32.mrb[52].mxu0  ;;  %v1289_v31 = vpop.f32.mrb[52].mxu1 }
 0x234   :  { %v1226_v36 = vpop.f32.mrb[53].mxu0  ;;  %v1290_v37 = vpop.f32.mrb[53].mxu1 }
 0x235   :  { %1089 = vst [vmem:[#allocation8 + $0x48] sm:$0xff] %v1053_v0  ;;  %v1227_v38 = vadd.f32 %v1226_v36, %v1225_v30  ;;  %v1291_v39 = vadd.f32 %v1290_v37, %v1289_v31  ;;  %v1228_v40 = vpop.f32.mrb[54].mxu0  ;;  %v1292_v41 = vpop.f32.mrb[54].mxu1 }
 0x236   :  { %v1229_v42 = vpop.f32.mrb[55].mxu0  ;;  %v1293_v43 = vpop.f32.mrb[55].mxu1 }
 0x237   :  { %v961_v44 = vadd.f32 %v1227_v38, %v1666_v34  ;;  %v1230_v45 = vadd.f32 %v1229_v42, %v1228_v40  ;;  %v1294_v46 = vadd.f32 %v1293_v43, %v1292_v41 }
 0x239   :  { %v1058_v47 = vadd.f32 %v1291_v39, %v961_v44  ;;  %v964_v48 = vadd.f32 %v1230_v45, %v1666_v34 }
 0x23b   :  { %1090 = vst [vmem:[#allocation8 + $0x50] sm:$0xff] %v1058_v47  ;;  %v1061_v49 = vadd.f32 %v1294_v46, %v964_v48  ;;  %v1231_v50 = vpop.f32.mrb[56].mxu0  ;;  %v1295_v51 = vpop.f32.mrb[56].mxu1 }
 0x23c   :  { %v1232_v52 = vpop.f32.mrb[57].mxu0  ;;  %v1296_v53 = vpop.f32.mrb[57].mxu1 }
 0x23d   :  { %1091 = vst [vmem:[#allocation8 + $0x58] sm:$0xff] %v1061_v49  ;;  %v1233_v54 = vadd.f32 %v1232_v52, %v1231_v50  ;;  %v1297_v55 = vadd.f32 %v1296_v53, %v1295_v51  ;;  %v1234_v56 = vpop.f32.mrb[58].mxu0  ;;  %v1298_v57 = vpop.f32.mrb[58].mxu1 }
 0x23e   :  { %v1235_v58 = vpop.f32.mrb[59].mxu0  ;;  %v1299_v59 = vpop.f32.mrb[59].mxu1 }
 0x23f   :  { %v969_v60 = vadd.f32 %v1233_v54, %v1666_v34  ;;  %v1236_v61 = vadd.f32 %v1235_v58, %v1234_v56  ;;  %v1300_v62 = vadd.f32 %v1299_v59, %v1298_v57 }
 0x241   :  { %v1066_v63 = vadd.f32 %v1297_v55, %v969_v60  ;;  %v972_v1 = vadd.f32 %v1236_v61, %v1666_v34 }
 0x243   :  { %1092 = vst [vmem:[#allocation8 + $0x60] sm:$0xff] %v1066_v63  ;;  %v1069_v2 = vadd.f32 %v1300_v62, %v972_v1  ;;  %v1237_v3 = vpop.f32.mrb[60].mxu0  ;;  %v1301_v4 = vpop.f32.mrb[60].mxu1 }
 0x244   :  { %v1238_v5 = vpop.f32.mrb[61].mxu0  ;;  %v1302_v6 = vpop.f32.mrb[61].mxu1 }
 0x245   :  { %1093 = vst [vmem:[#allocation8 + $0x68] sm:$0xff] %v1069_v2  ;;  %v1239_v7 = vadd.f32 %v1238_v5, %v1237_v3  ;;  %v1303_v8 = vadd.f32 %v1302_v6, %v1301_v4  ;;  %v1240_v9 = vpop.f32.mrb[62].mxu0  ;;  %v1304_v10 = vpop.f32.mrb[62].mxu1 }
 0x246   :  { %v1241_v11 = vpop.f32.mrb[63].mxu0  ;;  %v1305_v12 = vpop.f32.mrb[63].mxu1 }
 0x247   :  { %v977_v13 = vadd.f32 %v1239_v7, %v1666_v34  ;;  %v1242_v14 = vadd.f32 %v1241_v11, %v1240_v9  ;;  %v1306_v32 = vadd.f32 %v1305_v12, %v1304_v10 }
 0x249   :  { %v1074_v15 = vadd.f32 %v1303_v8, %v977_v13  ;;  %v980_v33 = vadd.f32 %v1242_v14, %v1666_v34 }
 0x24b   :  { %1094 = vst [vmem:[#allocation8 + $0x70] sm:$0xff] %v1074_v15  ;;  %v1077_v16 = vadd.f32 %v1306_v32, %v980_v33 }
 0x24d   :  { %1095 = vst [vmem:[#allocation8 + $0x78] sm:$0xff] %v1077_v16 }
 0x24e   :  { %1475 = shalt.err (!%p1472_p0)
}
 0x24f   :  { %s1476_s14 = scalar_lea.hbm %s1704_s5, 2048 }
 0x250   :  { %p1477_p1 = scmp.ne.s32.totalorder %s1704_s5, %s1476_s14  ;;  %p1480_p2 = scmp.lt.u32.totalorder %s1476_s14, %s1704_s5 }
 0x252   :  { %p1482_p3 = pnand %p1480_p2, %p1477_p1 }
 0x254   :  { %1485 = shalt.err (!%p1482_p3)
}
 0x255   :  { %1107 = dma.vmem_to_hbm [thread:$0]  %s1102_s10, 2048, %s1704_s5, [#allocation4], %s1496_s1, %s1496_s1, %s1497_s17  }
 0x256   :  { %1490 = dma.done.wait [#allocation4], 2048  }
 0x257   :  { %1491 = vsyncadd [#allocation4], 4294965248 }
 0x258   :  { %1111 = vsyncpa [#allocation3], 1 }
 0x259   :  { %1112 = vsyncpa [#allocation6], 1 }
 0x25a   :  { %1113 = vsyncpa [#allocation4], 1 }

</bundles_post_ra>
